<compile_context>
chip_gen: v5e
topology: v5e:2x2
jax: 0.10.0
libtpu: 0.0.40
codegen_flags: <defaults>
</compile_context>

<pallas_src>
import functools
import math

import jax
import jax.numpy as jnp
from jax.experimental import pallas as pl
from jax.experimental.pallas import tpu as pltpu


def _softplus(x):
    # torch.nn.functional.softplus: linear above threshold=20, log1p(exp(x)) otherwise.
    return jnp.where(x > 20.0, x, jnp.log1p(jnp.exp(jnp.minimum(x, 20.0))))


def _scalar_params(lengthscale, sigma, alpha):
    """Hoisted scalar work: [softplus(sigma)^2, 1/(alpha*softplus(lengthscale)^2)]."""
    ls = _softplus(jnp.asarray(lengthscale, jnp.float32).reshape(()))
    sig = _softplus(jnp.asarray(sigma, jnp.float32).reshape(()))
    sig2 = sig * sig
    inv_denom = 1.0 / (alpha * ls * ls)  # ls = softplus(.) > 0, so denom > 0
    return jnp.stack([sig2, inv_denom]).astype(jnp.float32)


def _apply_power(base, sig2, alpha):
    """sig2 * base ** (-alpha/2), specialized on the static alpha."""
    if alpha == 1.0:
        return sig2 * jax.lax.rsqrt(base)          # single EUP op per vreg
    if alpha == 2.0:
        return sig2 / base                          # single reciprocal
    return sig2 * jnp.exp((-0.5 * alpha) * jnp.log(base))


def _rq_kernel_from_diff(scal_ref, d_ref, out_ref, *, alpha):
    # scal_ref: SMEM (2,) = [sig2, inv_denom]; d_ref/out_ref: (TL, L2) VMEM tiles.
    sig2 = scal_ref[0]
    inv_denom = scal_ref[1]
    d = d_ref[...]
    base = 1.0 + (d * d) * inv_denom
    out_ref[...] = _apply_power(base, sig2, alpha)


def _rq_kernel_from_times(scal_ref, ti_ref, tj_ref, out_ref, *, alpha):
    # ti_ref: (1, TL, 1), tj_ref: (1, 1, L) -> pairwise diff regenerated in VMEM.
    sig2 = scal_ref[0]
    inv_denom = scal_ref[1]
    d = ti_ref[...] - tj_ref[...]                   # broadcast to (1, TL, L)
    base = 1.0 + (d * d) * inv_denom
    out_ref[...] = _apply_power(base, sig2, alpha)


def _row_tile(rows, cols, target_bytes=2 * 1024 * 1024):
    """Largest row tile whose (tile, cols) f32 block stays under ~2 MiB (multiple of 8),
    or the full row extent if it already fits. Safe for v5e/v6e/v7x scoped-VMEM defaults."""
    if rows * cols * 4 <= target_bytes:
        return int(rows)
    tl = (target_bytes // (cols * 4)) // 8 * 8
    return int(max(8, min(tl, rows)))


def rational_quadratic_forward(time_diff, lengthscale, sigma, base_intensity=None, alpha=1.0):
    """Matches the module's forward: time_diff (..., L1, L2) -> scores of the same shape.
    base_intensity is accepted for API parity; it does not enter the returned scores."""
    alpha = float(alpha)
    time_diff = time_diff.astype(jnp.float32)
    orig_shape = time_diff.shape
    L2 = orig_shape[-1]
    rows = math.prod(orig_shape[:-1])
    d2 = time_diff.reshape(rows, L2)                # lane-dense, batch folded into rows

    scalars = _scalar_params(lengthscale, sigma, alpha)
    tl = _row_tile(rows, L2)
    grid = (pl.cdiv(rows, tl),)

    out = pl.pallas_call(
        functools.partial(_rq_kernel_from_diff, alpha=alpha),
        out_shape=jax.ShapeDtypeStruct((rows, L2), jnp.float32),
        grid=grid,
        in_specs=[
            pl.BlockSpec(memory_space=pltpu.MemorySpace.SMEM),   # [sig2, inv_denom]
            pl.BlockSpec((tl, L2), lambda i: (i, 0)),
        ],
        out_specs=pl.BlockSpec((tl, L2), lambda i: (i, 0)),
        compiler_params=pltpu.CompilerParams(dimension_semantics=("parallel",)),
    )(scalars, d2)
    return out.reshape(orig_shape)


def rational_quadratic_forward_fused(t, lengthscale, sigma, base_intensity=None, alpha=1.0):
    """Fused variant: takes event times t (B, L) and computes time_diff = t_i - t_j inside the
    kernel, so the kernel is write-only on HBM (no (B, L, L) input materialized)."""
    alpha = float(alpha)
    t = t.astype(jnp.float32)
    B, L = t.shape
    t_rows = t.reshape(B, L, 1)
    t_cols = t.reshape(B, 1, L)

    scalars = _scalar_params(lengthscale, sigma, alpha)
    tl = _row_tile(L, L)
    grid = (B, pl.cdiv(L, tl))

    return pl.pallas_call(
        functools.partial(_rq_kernel_from_times, alpha=alpha),
        out_shape=jax.ShapeDtypeStruct((B, L, L), jnp.float32),
        grid=grid,
        in_specs=[
            pl.BlockSpec(memory_space=pltpu.MemorySpace.SMEM),        # [sig2, inv_denom]
            pl.BlockSpec((1, tl, 1), lambda b, i: (b, i, 0)),          # row times
            pl.BlockSpec((1, 1, L), lambda b, i: (b, 0, 0)),           # col times
        ],
        out_specs=pl.BlockSpec((1, tl, L), lambda b, i: (b, i, 0)),
        compiler_params=pltpu.CompilerParams(dimension_semantics=("parallel", "parallel")),
    )(scalars, t_rows, t_cols)


def reference_forward(time_diff, lengthscale, sigma, alpha=1.0):
    ls = _softplus(lengthscale)
    sig = _softplus(sigma)
    return (sig ** 2) * (1.0 + time_diff ** 2 / (alpha * ls ** 2)) ** (-alpha / 2.0)


# TODO(synk): num_types > 1 branch (Linear+Softplus heads over type embeddings) is not implemented;
# only the num_types == 1 scalar-parameter forward path is translated.

if __name__ == "__main__":
    key = jax.random.PRNGKey(0)
    k_ls, k_sig, k_bi, k_t = jax.random.split(key, 4)

    # Parameters from __init__ (num_types=1): three torch.randn(1) leaf parameters.
    lengthscale = jax.random.normal(k_ls, (1,), dtype=jnp.float32)
    sigma = jax.random.normal(k_sig, (1,), dtype=jnp.float32)
    base_intensity = jax.random.normal(k_bi, (1,), dtype=jnp.float32)

    # Pairwise time differences: batch=2, seq=128 -> (2, 128, 128)
    B, L = 2, 128
    t = jax.random.uniform(k_t, (B, L), dtype=jnp.float32) * 10.0
    time_diff = t[:, :, None] - t[:, None, :]

    alpha = 1.0
    ref = reference_forward(time_diff, lengthscale[0], sigma[0], alpha)

    # Module-interface path (time_diff input).
    scores = rational_quadratic_forward(time_diff, lengthscale, sigma, base_intensity, alpha)
    scores = jax.block_until_ready(scores)
    assert scores.shape == time_diff.shape
    assert jnp.allclose(scores, ref, atol=1e-5, rtol=1e-5), "mismatch vs reference (diff path)"

    # Fused path (pairwise diff regenerated in-kernel).
    scores_fused = rational_quadratic_forward_fused(t, lengthscale, sigma, base_intensity, alpha)
    scores_fused = jax.block_until_ready(scores_fused)
    assert scores_fused.shape == time_diff.shape
    assert jnp.allclose(scores_fused, ref, atol=1e-5, rtol=1e-5), "mismatch vs reference (fused path)"

    print("KERNEL_OK")
</pallas_src>

<mosaic_0001>
module attributes {stable_mosaic.version = 11 : i64} {
  func.func @_rq_kernel_from_diff(%arg0: i32, %arg1: memref<2xf32, #tpu.memory_space<smem>>, %arg2: memref<256x128xf32, #tpu.memory_space<vmem>>, %arg3: memref<256x128xf32, #tpu.memory_space<vmem>>) attributes {dimension_semantics = [#tpu.dimension_semantics<parallel>], iteration_bounds = array<i64: 1>, scalar_prefetch = 0 : i64, scratch_operands = 0 : i64, tpu.core_type = #tpu.core_type<tc>, window_params = [{transform_indices = @transform_0, window_bounds = array<i64: 2>}, {transform_indices = @transform_1, window_bounds = array<i64: 256, 128>}, {transform_indices = @transform_2, window_bounds = array<i64: 256, 128>}]} {
    %c0 = arith.constant 0 : index
    %0 = memref.load %arg1[%c0] : memref<2xf32, #tpu.memory_space<smem>>
    %c1 = arith.constant 1 : index
    %1 = memref.load %arg1[%c1] : memref<2xf32, #tpu.memory_space<smem>>
    %c0_0 = arith.constant 0 : index
    %c0_1 = arith.constant 0 : index
    %2 = vector.load %arg2[%c0_0, %c0_1] : memref<256x128xf32, #tpu.memory_space<vmem>>, vector<256x128xf32>
    %3 = arith.mulf %2, %2 : vector<256x128xf32>
    %4 = vector.broadcast %1 : f32 to vector<256x128xf32>
    %5 = arith.mulf %3, %4 : vector<256x128xf32>
    %cst = arith.constant 1.000000e+00 : f32
    %6 = vector.broadcast %cst : f32 to vector<256x128xf32>
    %7 = arith.addf %6, %5 : vector<256x128xf32>
    %8 = math.rsqrt %7 : vector<256x128xf32>
    %9 = vector.broadcast %0 : f32 to vector<256x128xf32>
    %10 = arith.mulf %9, %8 : vector<256x128xf32>
    %c0_2 = arith.constant 0 : index
    %c0_3 = arith.constant 0 : index
    %11 = vector.load %arg3[%c0_2, %c0_3] : memref<256x128xf32, #tpu.memory_space<vmem>>, vector<256x128xf32>
    tpu.vector_store %arg3[%c0_2, %c0_3], %10 {strides = array<i32>} : memref<256x128xf32, #tpu.memory_space<vmem>>, vector<256x128xf32>,
    return
  }
  func.func @transform_0(%arg0: i32) -> i32 {
    %c0_i32 = arith.constant 0 : i32
    %c0_i32_0 = arith.constant 0 : i32
    return %c0_i32 : i32
  }
  func.func @transform_1(%arg0: i32) -> (i32, i32) {
    %c0_i32 = arith.constant 0 : i32
    %c0_i32_0 = arith.constant 0 : i32
    return %arg0, %c0_i32 : i32, i32
  }
  func.func @transform_2(%arg0: i32) -> (i32, i32) {
    %c0_i32 = arith.constant 0 : i32
    %c0_i32_0 = arith.constant 0 : i32
    return %arg0, %c0_i32 : i32, i32
  }
}

</mosaic_0001>

<bundles_post_ra>
// kernel: tpu_custom_call.1
= control target key start
LH: loop header
LB: loop body
LE: loop exit
PB: predicated region body
PF: predicated region fallthrough
CT: control target
= control target key end

     0   :  { %7 = vsyncpa [#allocation5], 0  ;;  %s1376_s0 = inlined_call_operand.hbm [shape: f32[2], index: 0, kind: input, shape index: {}]   ;;  %s1377_s1 = inlined_call_operand.hbm [shape: f32[256,128], index: 1, kind: input, shape index: {}]   ;;  %s1378_s2 = inlined_call_operand.hbm [shape: f32[256,128], index: 2, kind: output, shape index: {}]  }
   0x1   :  { %8 = vsyncpa [#allocation3], 0 }
   0x2   :  { %9 = vsyncpa [#allocation4], 0  ;;  %s15_s11 = sshll.u32 %s1376_s0, 4  ;;  %s23_s14 = sshll.u32 %s1377_s1, 4  ;;  %s16_s11 = int_to_ptr.hbm [resolvable:$true] %s15_s11  ;;  %s24_s14 = int_to_ptr.hbm [resolvable:$true] %s23_s14 }
   0x3   :  { %s713_s15 = smov [#allocation2]   ;;  %s714_s16 = smov [#allocation6]  }
   0x4   :  { %18 = dma.hbm_to_smem %s16_s11, 16, %s713_s15, [#allocation5]  }
   0x5   :  { %s25_s17 = sshll.u32 %s714_s16, 4  ;;  %s715_s18 = smov 128   ;;  %s26_s17 = int_to_ptr.vmem [resolvable:$true] %s25_s17 }
   0x6   :  { %s716_s19 = smov 8  }
   0x7   :  { %31 = dma.hbm_to_vmem [thread:$0]  %s24_s14, 4096, %s26_s17, [#allocation3], %s715_s18, %s715_s18, %s716_s19  }
   0x8   :  { %707 = dma.done.wait [#allocation5], 16  }
   0x9   :  { %708 = vsyncadd [#allocation5], 4294967280 }
   0xa   :  { %709 = dma.done.wait [#allocation3], 4096  }
   0xb   :  { %710 = vsyncadd [#allocation3], 4294963200 }
   0xc   :  { %40 = sfence }
   0xd   :  { %v43_v0 = vld [vmem:[#allocation6] sm:$0xff]  ;;  %s577_s0 = sld [smem:[#allocation2 + $0x1]]  ;;  %v44_v1 = vld [vmem:[#allocation6 + $0x8] sm:$0xff]  ;;  %v45_v2 = vld [vmem:[#allocation6 + $0x10] sm:$0xff]  ;;  %s717_s20 = smov [#allocation7]  }
   0xe   :  { %v46_v3 = vld [vmem:[#allocation6 + $0x18] sm:$0xff]  ;;  %v47_v4 = vld [vmem:[#allocation6 + $0x20] sm:$0xff]  ;;  %v48_v5 = vld [vmem:[#allocation6 + $0x28] sm:$0xff]  ;;  %v75_v8 = vmul.f32 %v43_v0, %v43_v0  ;;  %v76_v9 = vmul.f32 %v44_v1, %v44_v1  ;;  %v77_v10 = vmul.f32 %v45_v2, %v45_v2  ;;  %s742_s1 = sld [smem:[#allocation2]]  ;;  %s561_s21 = sshll.u32 %s717_s20, 4  ;;  %s562_s21 = int_to_ptr.vmem [resolvable:$true] %s561_s21 }
   0xf   :  { %v49_v6 = vld [vmem:[#allocation6 + $0x30] sm:$0xff]  ;;  %v50_v7 = vld [vmem:[#allocation6 + $0x38] sm:$0xff]  ;;  %v78_v11 = vmul.f32 %v46_v3, %v46_v3  ;;  %v51_v12 = vld [vmem:[#allocation6 + $0x40] sm:$0xff]  ;;  %v79_v13 = vmul.f32 %v47_v4, %v47_v4  ;;  %v80_v14 = vmul.f32 %v48_v5, %v48_v5  ;;  %s563_s24 = sshll.u32 %s1378_s2, 4  ;;  %s564_s24 = int_to_ptr.hbm [resolvable:$true] %s563_s24 }
  0x10   :  { %v81_v15 = vmul.f32 %v49_v6, %v49_v6  ;;  %v82_v16 = vmul.f32 %v50_v7, %v50_v7  ;;  %v52_v17 = vld [vmem:[#allocation6 + $0x48] sm:$0xff]  ;;  %v83_v19 = vmul.f32 %v51_v12, %v51_v12  ;;  %v53_v24 = vld [vmem:[#allocation6 + $0x50] sm:$0xff]  ;;  %v54_v25 = vld [vmem:[#allocation6 + $0x58] sm:$0xff] }
  0x11   :  { %v55_v26 = vld [vmem:[#allocation6 + $0x60] sm:$0xff]  ;;  %v84_v30 = vmul.f32 %v52_v17, %v52_v17  ;;  %v56_v31 = vld [vmem:[#allocation6 + $0x68] sm:$0xff]  ;;  %v57_v32 = vld [vmem:[#allocation6 + $0x70] sm:$0xff]  ;;  %v85_v39 = vmul.f32 %v53_v24, %v53_v24  ;;  %v86_v40 = vmul.f32 %v54_v25, %v54_v25 }
  0x12   :  { %v58_v37 = vld [vmem:[#allocation6 + $0x78] sm:$0xff]  ;;  %v87_v41 = vmul.f32 %v55_v26, %v55_v26  ;;  %v88_v43 = vmul.f32 %v56_v31, %v56_v31  ;;  %v765_v44 = vmul.f32 %v57_v32, %v57_v32 }
  0x13   :  { %v744_v18 = vstv %s577_s0  ;;  %v773_v47 = vmul.f32 %v58_v37, %v58_v37 }
  0x14   :  { %v108_v20 = vmul.f32 %v744_v18, %v75_v8  ;;  %v109_v21 = vmul.f32 %v744_v18, %v76_v9  ;;  %v110_v22 = vmul.f32 %v744_v18, %v77_v10  ;;  %v111_v23 = vmul.f32 %v744_v18, %v78_v11 }
  0x15   :  { %v112_v27 = vmul.f32 %v744_v18, %v79_v13  ;;  %v113_v28 = vmul.f32 %v744_v18, %v80_v14  ;;  %v114_v29 = vmul.f32 %v744_v18, %v81_v15  ;;  %v115_v36 = vmul.f32 %v744_v18, %v82_v16 }
  0x16   :  { %v753_v33 = vadd.f32 1.0, %v108_v20  ;;  %v755_v34 = vadd.f32 1.0, %v109_v21  ;;  %v757_v35 = vadd.f32 1.0, %v110_v22  ;;  %v760_v38 = vadd.f32 1.0, %v111_v23 }
  0x17   :  { %v763_v42 = vadd.f32 1.0, %v112_v27  ;;  %v768_v45 = vstv %s742_s1  ;;  %v771_v46 = vadd.f32 1.0, %v113_v28  ;;  %v776_v48 = vadd.f32 1.0, %v114_v29 }
  0x18   :  { %583 = vrsqrt.f32 %v753_v33  ;;  %v778_v49 = vadd.f32 1.0, %v115_v36  ;;  %v116_v50 = vmul.f32 %v744_v18, %v83_v19  ;;  %v117_v51 = vmul.f32 %v744_v18, %v84_v30 }
  0x19   :  { %585 = vrsqrt.f32 %v755_v34  ;;  %v118_v52 = vmul.f32 %v744_v18, %v85_v39  ;;  %v119_v53 = vmul.f32 %v744_v18, %v86_v40  ;;  %vm178_vm0 = vweird.f32 %v753_v33 }
  0x1a   :  { %587 = vrsqrt.f32 %v757_v35  ;;  %v787_v54 = vadd.f32 1.0, %v116_v50  ;;  %v120_v55 = vmul.f32 %v744_v18, %v87_v41  ;;  %vm188_vm1 = vweird.f32 %v755_v34 }
  0x1b   :  { %589 = vrsqrt.f32 %v760_v38  ;;  %vm198_vm2 = vweird.f32 %v757_v35  ;;  %v793_v56 = vadd.f32 1.0, %v117_v51  ;;  %vm208_vm3 = vweird.f32 %v760_v38 }
  0x1c   :  { %591 = vrsqrt.f32 %v763_v42  ;;  %v799_v58 = vadd.f32 1.0, %v118_v52  ;;  %v802_v59 = vmul.f32 %v744_v18, %v88_v43  ;;  %vm218_vm4 = vweird.f32 %v763_v42 }
  0x1d   :  { %593 = vrsqrt.f32 %v771_v46  ;;  %v810_v62 = vadd.f32 1.0, %v119_v53  ;;  %v812_v63 = vadd.f32 1.0, %v120_v55  ;;  %vm228_vm7 = vweird.f32 %v771_v46 }
  0x1e   :  { %v795_v57 = vpop.eup %583  ;;  %595 = vrsqrt.f32 %v776_v48  ;;  %vm238_vm9 = vweird.f32 %v776_v48  ;;  %vm248_vm15 = vweird.f32 %v778_v49 }
  0x1f   :  { %v804_v60 = vpop.eup %585  ;;  %v173_v61 = vmul.f32 %v795_v57, %v753_v33  ;;  %597 = vrsqrt.f32 %v778_v49  ;;  %vm179_vm5 = vweird.f32 %v795_v57 }
  0x20   :  { %v814_v0 = vpop.eup %587  ;;  %v183_v1 = vmul.f32 %v804_v60, %v755_v34  ;;  %vm189_vm6 = vweird.f32 %v804_v60  ;;  %599 = vrsqrt.f32 %v787_v54  ;;  %vm860_vm13 = vmor %vm178_vm0, %vm179_vm5 }
  0x21   :  { %v822_v2 = vpop.eup %589  ;;  %v174_v3 = vmul.f32 %v795_v57, %v173_v61  ;;  %v193_v4 = vmul.f32 %v814_v0, %v757_v35  ;;  %vm199_vm8 = vweird.f32 %v814_v0  ;;  %601 = vrsqrt.f32 %v793_v56  ;;  %vm874_vm0 = vmor %vm188_vm1, %vm189_vm6 }
  0x22   :  { %v830_v5 = vpop.eup %591  ;;  %v184_v6 = vmul.f32 %v804_v60, %v183_v1  ;;  %v203_v7 = vmul.f32 %v822_v2, %v760_v38  ;;  %vm209_vm10 = vweird.f32 %v822_v2  ;;  %603 = vrsqrt.f32 %v799_v58  ;;  %vm886_vm5 = vmor %vm198_vm2, %vm199_vm8 }
  0x23   :  { %v837_v8 = vpop.eup %593  ;;  %v175_v9 = vmul.f32 0.5, %v174_v3  ;;  %v194_v10 = vmul.f32 %v814_v0, %v193_v4  ;;  %v213_v11 = vmul.f32 %v830_v5, %v763_v42  ;;  %vm219_vm11 = vweird.f32 %v830_v5  ;;  %vm900_vm1 = vmor %vm208_vm3, %vm209_vm10 }
  0x24   :  { %v843_v12 = vpop.eup %595  ;;  %v185_v13 = vmul.f32 0.5, %v184_v6  ;;  %v204_v14 = vmul.f32 %v822_v2, %v203_v7  ;;  %v223_v15 = vmul.f32 %v837_v8, %v771_v46  ;;  %vm229_vm12 = vweird.f32 %v837_v8  ;;  %vm913_vm2 = vmor %vm218_vm4, %vm219_vm11 }
  0x25   :  { %v849_v16 = vpop.eup %597  ;;  %v176_v17 = vsub.f32 1.5, %v175_v9  ;;  %v195_v19 = vmul.f32 0.5, %v194_v10  ;;  %v214_v20 = vmul.f32 %v830_v5, %v213_v11  ;;  %v233_v21 = vmul.f32 %v843_v12, %v776_v48  ;;  %vm927_vm6 = vmor %vm228_vm7, %vm229_vm12 }
  0x26   :  { %v854_v22 = vpop.eup %599  ;;  %v186_v24 = vsub.f32 1.5, %v185_v13  ;;  %v205_v25 = vmul.f32 0.5, %v204_v14  ;;  %v224_v26 = vmul.f32 %v837_v8, %v223_v15  ;;  %vm239_vm14 = vweird.f32 %v843_v12 }
  0x27   :  { %v867_v27 = vpop.eup %601  ;;  %v177_v28 = vmul.f32 %v795_v57, %v176_v17  ;;  %v196_v30 = vsub.f32 1.5, %v195_v19  ;;  %v215_v31 = vmul.f32 0.5, %v214_v20  ;;  %v234_v32 = vmul.f32 %v843_v12, %v233_v21  ;;  %vm940_vm4 = vmor %vm238_vm9, %vm239_vm14 }
  0x28   :  { %v879_v33 = vpop.eup %603  ;;  %v187_v36 = vmul.f32 %v804_v60, %v186_v24  ;;  %v206_v34 = vsub.f32 1.5, %v205_v25  ;;  %v225_v39 = vmul.f32 0.5, %v224_v26  ;;  %v243_v40 = vmul.f32 %v849_v16, %v778_v49 }
  0x29   :  { %v181_v41 = vsel %vm860_vm13, %v795_v57, %v177_v28  ;;  %v197_v43 = vmul.f32 %v814_v0, %v196_v30  ;;  %v216_v50 = vsub.f32 1.5, %v215_v31  ;;  %v235_v51 = vmul.f32 0.5, %v234_v32  ;;  %v59_v31 = vld [vmem:[#allocation6 + $0x80] sm:$0xff]  ;;  %v60_v32 = vld [vmem:[#allocation6 + $0x88] sm:$0xff] }
  0x2a   :  { %v493_v52 = vmul.f32 %v768_v45, %v181_v41  ;;  %v191_v53 = vsel %vm874_vm0, %v804_v60, %v187_v36  ;;  %v207_v55 = vmul.f32 %v822_v2, %v206_v34  ;;  %v226_v57 = vsub.f32 1.5, %v225_v39 }
  0x2b   :  { %vm258_vm3 = vweird.f32 %v787_v54  ;;  %v494_v61 = vmul.f32 %v768_v45, %v191_v53  ;;  %v201_v1 = vsel %vm886_vm5, %v814_v0, %v197_v43  ;;  %v217_v60 = vmul.f32 %v830_v5, %v216_v50 }
  0x2c   :  { %v236_v3 = vsub.f32 1.5, %v235_v51  ;;  %525 = vst [vmem:[#allocation7] sm:$0xff] %v493_v52  ;;  %v495_v4 = vmul.f32 %v768_v45, %v201_v1  ;;  %v211_v6 = vsel %vm900_vm1, %v822_v2, %v207_v55  ;;  %v227_v0 = vmul.f32 %v837_v8, %v226_v57  ;;  %v61_v51 = vld [vmem:[#allocation6 + $0x90] sm:$0xff] }
  0x2d   :  { %v244_v7 = vmul.f32 %v849_v16, %v243_v40  ;;  %526 = vst [vmem:[#allocation7 + $0x8] sm:$0xff] %v494_v61  ;;  %v496_v9 = vmul.f32 %v768_v45, %v211_v6  ;;  %v221_v10 = vsel %vm913_vm2, %v830_v5, %v217_v60  ;;  %vm249_vm7 = vweird.f32 %v849_v16 }
  0x2e   :  { %v237_v2 = vmul.f32 %v843_v12, %v236_v3  ;;  %527 = vst [vmem:[#allocation7 + $0x10] sm:$0xff] %v495_v4  ;;  %v497_v48 = vmul.f32 %v768_v45, %v221_v10  ;;  %v231_v11 = vsel %vm927_vm6, %v837_v8, %v227_v0  ;;  %v253_v14 = vmul.f32 %v854_v22, %v787_v54  ;;  %vm973_vm9 = vmor %vm248_vm15, %vm249_vm7 }
  0x2f   :  { %v245_v13 = vmul.f32 0.5, %v244_v7  ;;  %528 = vst [vmem:[#allocation7 + $0x18] sm:$0xff] %v496_v9  ;;  %v498_v15 = vmul.f32 %v768_v45, %v231_v11  ;;  %v263_v17 = vmul.f32 %v867_v27, %v793_v56  ;;  %v964_v19 = vadd.f32 1.0, %v802_v59 }
  0x30   :  { %v241_v5 = vsel %vm940_vm4, %v843_v12, %v237_v2  ;;  %529 = vst [vmem:[#allocation7 + $0x20] sm:$0xff] %v497_v48  ;;  %v254_v21 = vmul.f32 %v854_v22, %v253_v14  ;;  %vm268_vm8 = vweird.f32 %v793_v56  ;;  %v273_v23 = vmul.f32 %v879_v33, %v799_v58  ;;  %v62_v14 = vld [vmem:[#allocation6 + $0x98] sm:$0xff] }
  0x31   :  { %v499_v8 = vmul.f32 %v768_v45, %v241_v5  ;;  %v246_v20 = vsub.f32 1.5, %v245_v13  ;;  %530 = vst [vmem:[#allocation7 + $0x28] sm:$0xff] %v498_v15  ;;  %v264_v59 = vmul.f32 %v867_v27, %v263_v17  ;;  %vm278_vm10 = vweird.f32 %v799_v58 }
  0x32   :  { %605 = vrsqrt.f32 %v810_v62  ;;  %v255_v25 = vmul.f32 0.5, %v254_v21  ;;  %vm259_vm11 = vweird.f32 %v854_v22  ;;  %vm269_vm12 = vweird.f32 %v867_v27 }
  0x33   :  { %531 = vst [vmem:[#allocation7 + $0x30] sm:$0xff] %v499_v8  ;;  %v247_v24 = vmul.f32 %v849_v16, %v246_v20  ;;  %607 = vrsqrt.f32 %v812_v63  ;;  %v265_v49 = vmul.f32 0.5, %v264_v59  ;;  %v274_v26 = vmul.f32 %v879_v33, %v273_v23  ;;  %vm997_vm14 = vmor %vm258_vm3, %vm259_vm11 }
  0x34   :  { %609 = vrsqrt.f32 %v964_v19  ;;  %v256_v29 = vsub.f32 1.5, %v255_v25  ;;  %vm279_vm13 = vweird.f32 %v879_v33  ;;  %v122_v30 = vmul.f32 %v744_v18, %v765_v44  ;;  %vm1008_vm15 = vmor %vm268_vm8, %vm269_vm12  ;;  %v65_v44 = vld [vmem:[#allocation6 + $0xb0] sm:$0xff] }
  0x35   :  { %v251_v28 = vsel %vm973_vm9, %v849_v16, %v247_v24  ;;  %v266_v34 = vsub.f32 1.5, %v265_v49  ;;  %v275_v39 = vmul.f32 0.5, %v274_v26  ;;  %v123_v16 = vmul.f32 %v744_v18, %v773_v47  ;;  %vm1026_vm1 = vmor %vm278_vm10, %vm279_vm13 }
  0x36   :  { %v500_v36 = vmul.f32 %v768_v45, %v251_v28  ;;  %v257_v40 = vmul.f32 %v854_v22, %v256_v29  ;;  %vm288_vm0 = vweird.f32 %v810_v62  ;;  %vm298_vm5 = vweird.f32 %v812_v63 }
  0x37   :  { %v1014_v54 = vadd.f32 1.0, %v122_v30  ;;  %v267_v47 = vmul.f32 %v867_v27, %v266_v34  ;;  %v276_v43 = vsub.f32 1.5, %v275_v39  ;;  %v91_v35 = vmul.f32 %v59_v31, %v59_v31  ;;  %v64_v34 = vld [vmem:[#allocation6 + $0xa8] sm:$0xff] }
  0x38   :  { %v1016_v41 = vpop.eup %605  ;;  %532 = vst [vmem:[#allocation7 + $0x38] sm:$0xff] %v500_v36  ;;  %v92_v50 = vmul.f32 %v60_v32, %v60_v32  ;;  %v261_v52 = vsel %vm997_vm14, %v854_v22, %v257_v40  ;;  %v1033_v38 = vadd.f32 1.0, %v123_v16  ;;  %v93_v4 = vmul.f32 %v61_v51, %v61_v51  ;;  %v63_v32 = vld [vmem:[#allocation6 + $0xa0] sm:$0xff] }
  0x39   :  { %v608_v56 = vpop.eup %607  ;;  %v283_v55 = vmul.f32 %v1016_v41, %v810_v62  ;;  %611 = vrsqrt.f32 %v1014_v54  ;;  %v501_v61 = vmul.f32 %v768_v45, %v261_v52  ;;  %v271_v22 = vsel %vm1008_vm15, %v867_v27, %v267_v47  ;;  %v67_v52 = vld [vmem:[#allocation6 + $0xc0] sm:$0xff] }
  0x3a   :  { %v610_v57 = vpop.eup %609  ;;  %v277_v58 = vmul.f32 %v879_v33, %v276_v43  ;;  %v293_v1 = vmul.f32 %v608_v56, %v812_v63  ;;  %v502_v60 = vmul.f32 %v768_v45, %v271_v22  ;;  %vm289_vm2 = vweird.f32 %v1016_v41 }
  0x3b   :  { %v284_v42 = vmul.f32 %v1016_v41, %v283_v55  ;;  %v303_v3 = vmul.f32 %v610_v57, %v964_v19  ;;  %533 = vst [vmem:[#allocation7 + $0x40] sm:$0xff] %v501_v61  ;;  %vm308_vm3 = vweird.f32 %v964_v19  ;;  %613 = vrsqrt.f32 %v1033_v38  ;;  %vm1060_vm7 = vmor %vm288_vm0, %vm289_vm2 }
  0x3c   :  { %v281_v6 = vsel %vm1026_vm1, %v879_v33, %v277_v58  ;;  %v294_v0 = vmul.f32 %v608_v56, %v293_v1  ;;  %534 = vst [vmem:[#allocation7 + $0x48] sm:$0xff] %v502_v60  ;;  %vm299_vm6 = vweird.f32 %v608_v56  ;;  %v124_v10 = vmul.f32 %v744_v18, %v91_v35  ;;  %v66_v35 = vld [vmem:[#allocation6 + $0xb8] sm:$0xff] }
  0x3d   :  { %v503_v27 = vmul.f32 %v768_v45, %v281_v6  ;;  %v285_v46 = vmul.f32 0.5, %v284_v42  ;;  %v304_v7 = vmul.f32 %v610_v57, %v303_v3  ;;  %v125_v2 = vmul.f32 %v744_v18, %v92_v50  ;;  %vm1073_vm9 = vmor %vm298_vm5, %vm299_vm6 }
  0x3e   :  { %v295_v9 = vmul.f32 0.5, %v294_v0  ;;  %vm309_vm4 = vweird.f32 %v610_v57  ;;  %v126_v13 = vmul.f32 %v744_v18, %v93_v4  ;;  %vm318_vm8 = vweird.f32 %v1014_v54 }
  0x3f   :  { %v1053_v48 = vpop.eup %611  ;;  %535 = vst [vmem:[#allocation7 + $0x50] sm:$0xff] %v503_v27  ;;  %v286_v33 = vsub.f32 1.5, %v285_v46  ;;  %v305_v11 = vmul.f32 0.5, %v304_v7  ;;  %v1067_v8 = vadd.f32 1.0, %v124_v10  ;;  %v1077_v12 = vadd.f32 1.0, %v125_v2  ;;  %vm1083_vm10 = vmor %vm308_vm3, %vm309_vm4 }
  0x40   :  { %v296_v5 = vsub.f32 1.5, %v295_v9  ;;  %v313_v17 = vmul.f32 %v1053_v48, %v1014_v54  ;;  %v1079_v59 = vadd.f32 1.0, %v126_v13  ;;  %v94_v63 = vmul.f32 %v62_v14, %v62_v14 }
  0x41   :  { %v287_v20 = vmul.f32 %v1016_v41, %v286_v33  ;;  %v306_v62 = vsub.f32 1.5, %v305_v11  ;;  %615 = vrsqrt.f32 %v1067_v8  ;;  %v1089_v49 = vpop.eup %613  ;;  %vm319_vm11 = vweird.f32 %v1053_v48 }
  0x42   :  { %v297_v23 = vmul.f32 %v608_v56, %v296_v5  ;;  %v314_v25 = vmul.f32 %v1053_v48, %v313_v17  ;;  %617 = vrsqrt.f32 %v1077_v12  ;;  %v323_v31 = vmul.f32 %v1089_v49, %v1033_v38  ;;  %vm1113_vm14 = vmor %vm318_vm8, %vm319_vm11 }
  0x43   :  { %v291_v26 = vsel %vm1060_vm7, %v1016_v41, %v287_v20  ;;  %v307_v28 = vmul.f32 %v610_v57, %v306_v62  ;;  %vm328_vm12 = vweird.f32 %v1033_v38  ;;  %619 = vrsqrt.f32 %v1079_v59 }
  0x44   :  { %v504_v19 = vmul.f32 %v768_v45, %v291_v26  ;;  %v301_v29 = vsel %vm1073_vm9, %v608_v56, %v297_v23  ;;  %v315_v30 = vmul.f32 0.5, %v314_v25  ;;  %v324_v40 = vmul.f32 %v1089_v49, %v323_v31  ;;  %v68_v23 = vld [vmem:[#allocation6 + $0xc8] sm:$0xff] }
  0x45   :  { %v505_v36 = vmul.f32 %v768_v45, %v301_v29  ;;  %v311_v37 = vsel %vm1083_vm10, %v610_v57, %v307_v28  ;;  %vm338_vm13 = vweird.f32 %v1067_v8  ;;  %vm329_vm15 = vweird.f32 %v1089_v49 }
  0x46   :  { %536 = vst [vmem:[#allocation7 + $0x58] sm:$0xff] %v504_v19  ;;  %v506_v39 = vmul.f32 %v768_v45, %v311_v37  ;;  %v316_v16 = vsub.f32 1.5, %v315_v30  ;;  %vm348_vm0 = vweird.f32 %v1077_v12  ;;  %v127_v47 = vmul.f32 %v744_v18, %v94_v63  ;;  %vm1135_vm1 = vmor %vm328_vm12, %vm329_vm15 }
  0x47   :  { %537 = vst [vmem:[#allocation7 + $0x60] sm:$0xff] %v505_v36  ;;  %v95_v43 = vmul.f32 %v63_v32, %v63_v32  ;;  %v616_v50 = vpop.eup %615  ;;  %v325_v56 = vmul.f32 0.5, %v324_v40  ;;  %vm358_vm5 = vweird.f32 %v1079_v59  ;;  %v96_v54 = vmul.f32 %v64_v34, %v64_v34  ;;  %v69_v40 = vld [vmem:[#allocation6 + $0xd0] sm:$0xff] }
  0x48   :  { %538 = vst [vmem:[#allocation7 + $0x68] sm:$0xff] %v506_v39  ;;  %v317_v51 = vmul.f32 %v1053_v48, %v316_v16  ;;  %v618_v53 = vpop.eup %617  ;;  %v333_v55 = vmul.f32 %v616_v50, %v1067_v8  ;;  %v1123_v57 = vadd.f32 1.0, %v127_v47  ;;  %v97_v22 = vmul.f32 %v65_v44, %v65_v44 }
  0x49   :  { %v128_v61 = vmul.f32 %v744_v18, %v95_v43  ;;  %v326_v1 = vsub.f32 1.5, %v325_v56  ;;  %v343_v60 = vmul.f32 %v618_v53, %v1077_v12  ;;  %v98_v42 = vmul.f32 %v66_v35, %v66_v35  ;;  %v620_v3 = vpop.eup %619  ;;  %v70_v43 = vld [vmem:[#allocation6 + $0xd8] sm:$0xff] }
  0x4a   :  { %v321_v58 = vsel %vm1113_vm14, %v1053_v48, %v317_v51  ;;  %v334_v0 = vmul.f32 %v616_v50, %v333_v55  ;;  %621 = vrsqrt.f32 %v1123_v57  ;;  %v99_v27 = vmul.f32 %v67_v52, %v67_v52  ;;  %v71_v52 = vld [vmem:[#allocation6 + $0xe0] sm:$0xff] }
  0x4b   :  { %v507_v4 = vmul.f32 %v768_v45, %v321_v58  ;;  %v327_v46 = vmul.f32 %v1089_v49, %v326_v1  ;;  %vm339_vm2 = vweird.f32 %v616_v50  ;;  %v344_v7 = vmul.f32 %v618_v53, %v343_v60 }
  0x4c   :  { %v353_v9 = vmul.f32 %v620_v3, %v1079_v59  ;;  %v335_v10 = vmul.f32 0.5, %v334_v0  ;;  %v1142_v2 = vadd.f32 1.0, %v128_v61  ;;  %v129_v38 = vmul.f32 %v744_v18, %v96_v54  ;;  %vm1155_vm6 = vmor %vm338_vm13, %vm339_vm2 }
  0x4d   :  { %539 = vst [vmem:[#allocation7 + $0x70] sm:$0xff] %v507_v4  ;;  %v130_v48 = vmul.f32 %v744_v18, %v97_v22  ;;  %v331_v33 = vsel %vm1135_vm1, %v1089_v49, %v327_v46  ;;  %v345_v11 = vmul.f32 0.5, %v344_v7  ;;  %vm349_vm3 = vweird.f32 %v618_v53  ;;  %v72_v7 = vld [vmem:[#allocation6 + $0xe8] sm:$0xff] }
  0x4e   :  { %v354_v13 = vmul.f32 %v620_v3, %v353_v9  ;;  %v508_v14 = vmul.f32 %v768_v45, %v331_v33  ;;  %v336_v15 = vsub.f32 1.5, %v335_v10  ;;  %623 = vrsqrt.f32 %v1142_v2  ;;  %vm1166_vm7 = vmor %vm348_vm0, %vm349_vm3 }
  0x4f   :  { %v131_v5 = vmul.f32 %v744_v18, %v98_v42  ;;  %v346_v20 = vsub.f32 1.5, %v345_v11  ;;  %vm359_vm4 = vweird.f32 %v620_v3  ;;  %v1159_v62 = vadd.f32 1.0, %v129_v38 }
  0x50   :  { %v355_v21 = vmul.f32 0.5, %v354_v13  ;;  %v1161_v24 = vpop.eup %621  ;;  %540 = vst [vmem:[#allocation7 + $0x78] sm:$0xff] %v508_v14  ;;  %v337_v25 = vmul.f32 %v616_v50, %v336_v15  ;;  %v1170_v8 = vadd.f32 1.0, %v130_v48  ;;  %v132_v49 = vmul.f32 %v744_v18, %v99_v27  ;;  %vm1179_vm8 = vmor %vm358_vm5, %vm359_vm4 }
  0x51   :  { %v347_v26 = vmul.f32 %v618_v53, %v346_v20  ;;  %v363_v19 = vmul.f32 %v1161_v24, %v1123_v57  ;;  %625 = vrsqrt.f32 %v1159_v62  ;;  %v1184_v30 = vadd.f32 1.0, %v131_v5 }
  0x52   :  { %v356_v28 = vsub.f32 1.5, %v355_v21  ;;  %v341_v29 = vsel %vm1155_vm6, %v616_v50, %v337_v25  ;;  %v100_v31 = vmul.f32 %v68_v23, %v68_v23  ;;  %vm368_vm9 = vweird.f32 %v1123_v57 }
  0x53   :  { %v509_v32 = vmul.f32 %v768_v45, %v341_v29  ;;  %v351_v36 = vsel %vm1166_vm7, %v618_v53, %v347_v26  ;;  %v364_v34 = vmul.f32 %v1161_v24, %v363_v19  ;;  %627 = vrsqrt.f32 %v1170_v8 }
  0x54   :  { %v357_v37 = vmul.f32 %v620_v3, %v356_v28  ;;  %v1190_v39 = vpop.eup %623  ;;  %v510_v59 = vmul.f32 %v768_v45, %v351_v36  ;;  %v1195_v16 = vadd.f32 1.0, %v132_v49  ;;  %vm369_vm10 = vweird.f32 %v1161_v24 }
  0x55   :  { %541 = vst [vmem:[#allocation7 + $0x80] sm:$0xff] %v509_v32  ;;  %v365_v41 = vmul.f32 0.5, %v364_v34  ;;  %v373_v47 = vmul.f32 %v1190_v39, %v1142_v2  ;;  %vm378_vm11 = vweird.f32 %v1142_v2  ;;  %629 = vrsqrt.f32 %v1184_v30  ;;  %vm1214_vm12 = vmor %vm368_vm9, %vm369_vm10 }
  0x56   :  { %v361_v44 = vsel %vm1179_vm8, %v620_v3, %v357_v37  ;;  %542 = vst [vmem:[#allocation7 + $0x88] sm:$0xff] %v510_v59  ;;  %v133_v50 = vmul.f32 %v744_v18, %v100_v31  ;;  %631 = vrsqrt.f32 %v1195_v16  ;;  %v101_v54 = vmul.f32 %v69_v40, %v69_v40 }
  0x57   :  { %v511_v35 = vmul.f32 %v768_v45, %v361_v44  ;;  %v366_v51 = vsub.f32 1.5, %v365_v41  ;;  %v374_v56 = vmul.f32 %v1190_v39, %v373_v47  ;;  %v1208_v53 = vpop.eup %625  ;;  %vm388_vm13 = vweird.f32 %v1159_v62 }
  0x58   :  { %vm398_vm14 = vweird.f32 %v1170_v8  ;;  %v1220_v61 = vadd.f32 1.0, %v133_v50  ;;  %v102_v22 = vmul.f32 %v70_v43, %v70_v43  ;;  %vm379_vm15 = vweird.f32 %v1190_v39 }
  0x59   :  { %543 = vst [vmem:[#allocation7 + $0x90] sm:$0xff] %v511_v35  ;;  %v367_v58 = vmul.f32 %v1161_v24, %v366_v51  ;;  %v375_v1 = vmul.f32 0.5, %v374_v56  ;;  %v383_v60 = vmul.f32 %v1208_v53, %v1159_v62  ;;  %vm408_vm0 = vweird.f32 %v1184_v30  ;;  %v1227_v57 = vpop.eup %627  ;;  %vm1246_vm1 = vmor %vm378_vm11, %vm379_vm15 }
  0x5a   :  { %vm418_vm5 = vweird.f32 %v1195_v16  ;;  %633 = vrsqrt.f32 %v1220_v61  ;;  %v134_v42 = vmul.f32 %v744_v18, %v101_v54  ;;  %v135_v3 = vmul.f32 %v744_v18, %v102_v22 }
  0x5b   :  { %v103_v4 = vmul.f32 %v71_v52, %v71_v52  ;;  %v371_v6 = vsel %vm1214_vm12, %v1161_v24, %v367_v58  ;;  %v376_v0 = vsub.f32 1.5, %v375_v1  ;;  %v384_v27 = vmul.f32 %v1208_v53, %v383_v60  ;;  %v1239_v9 = vpop.eup %629  ;;  %v73_v58 = vld [vmem:[#allocation6 + $0xf0] sm:$0xff]  ;;  %v74_v1 = vld [vmem:[#allocation6 + $0xf8] sm:$0xff] }
  0x5c   :  { %v393_v46 = vmul.f32 %v1227_v57, %v1170_v8  ;;  %v512_v10 = vmul.f32 %v768_v45, %v371_v6  ;;  %vm389_vm2 = vweird.f32 %v1208_v53  ;;  %v1251_v48 = vadd.f32 1.0, %v134_v42  ;;  %v1255_v11 = vpop.eup %631 }
  0x5d   :  { %v1253_v33 = vadd.f32 1.0, %v135_v3  ;;  %v377_v13 = vmul.f32 %v1190_v39, %v376_v0  ;;  %v385_v14 = vmul.f32 0.5, %v384_v27  ;;  %v403_v2 = vmul.f32 %v1239_v9, %v1184_v30  ;;  %vm1276_vm6 = vmor %vm388_vm13, %vm389_vm2 }
  0x5e   :  { %v394_v15 = vmul.f32 %v1227_v57, %v393_v46  ;;  %544 = vst [vmem:[#allocation7 + $0x98] sm:$0xff] %v512_v10  ;;  %vm399_vm3 = vweird.f32 %v1227_v57  ;;  %v413_v5 = vmul.f32 %v1255_v11, %v1195_v16  ;;  %635 = vrsqrt.f32 %v1251_v48 }
  0x5f   :  { %v104_v17 = vmul.f32 %v72_v7, %v72_v7  ;;  %v381_v20 = vsel %vm1246_vm1, %v1190_v39, %v377_v13  ;;  %v386_v21 = vsub.f32 1.5, %v385_v14  ;;  %v404_v24 = vmul.f32 %v1239_v9, %v403_v2  ;;  %vm1290_vm7 = vmor %vm398_vm14, %vm399_vm3 }
  0x60   :  { %v395_v23 = vmul.f32 0.5, %v394_v15  ;;  %v1269_v25 = vpop.eup %633  ;;  %v513_v63 = vmul.f32 %v768_v45, %v381_v20  ;;  %vm409_vm4 = vweird.f32 %v1239_v9  ;;  %v414_v26 = vmul.f32 %v1255_v11, %v413_v5 }
  0x61   :  { %637 = vrsqrt.f32 %v1253_v33  ;;  %v387_v28 = vmul.f32 %v1208_v53, %v386_v21  ;;  %v405_v29 = vmul.f32 0.5, %v404_v24  ;;  %v423_v12 = vmul.f32 %v1269_v25, %v1220_v61  ;;  %vm1307_vm10 = vmor %vm408_vm0, %vm409_vm4 }
  0x62   :  { %v396_v19 = vsub.f32 1.5, %v395_v23  ;;  %545 = vst [vmem:[#allocation7 + $0xa0] sm:$0xff] %v513_v63  ;;  %v415_v31 = vmul.f32 0.5, %v414_v26  ;;  %vm419_vm8 = vweird.f32 %v1255_v11  ;;  %vm428_vm9 = vweird.f32 %v1220_v61 }
  0x63   :  { %v136_v32 = vmul.f32 %v744_v18, %v103_v4  ;;  %v391_v36 = vsel %vm1276_vm6, %v1208_v53, %v387_v28  ;;  %v406_v34 = vsub.f32 1.5, %v405_v29  ;;  %v424_v8 = vmul.f32 %v1269_v25, %v423_v12  ;;  %vm1322_vm12 = vmor %vm418_vm5, %vm419_vm8 }
  0x64   :  { %v397_v37 = vmul.f32 %v1227_v57, %v396_v19  ;;  %v636_v39 = vpop.eup %635  ;;  %v514_v59 = vmul.f32 %v768_v45, %v391_v36  ;;  %v416_v44 = vsub.f32 1.5, %v415_v31  ;;  %vm429_vm11 = vweird.f32 %v1269_v25 }
  0x65   :  { %v1312_v41 = vadd.f32 1.0, %v136_v32  ;;  %v407_v43 = vmul.f32 %v1239_v9, %v406_v34  ;;  %v425_v35 = vmul.f32 0.5, %v424_v8  ;;  %v433_v50 = vmul.f32 %v636_v39, %v1251_v48  ;;  %vm1343_vm13 = vmor %vm428_vm9, %vm429_vm11 }
  0x66   :  { %v401_v47 = vsel %vm1290_vm7, %v1227_v57, %v397_v37  ;;  %546 = vst [vmem:[#allocation7 + $0xa8] sm:$0xff] %v514_v59  ;;  %v417_v54 = vmul.f32 %v1255_v11, %v416_v44  ;;  %v137_v52 = vmul.f32 %v744_v18, %v104_v17  ;;  %vm438_vm14 = vweird.f32 %v1251_v48 }
  0x67   :  { %v638_v51 = vpop.eup %637  ;;  %v515_v56 = vmul.f32 %v768_v45, %v401_v47  ;;  %639 = vrsqrt.f32 %v1312_v41  ;;  %v411_v16 = vsel %vm1307_vm10, %v1239_v9, %v407_v43  ;;  %v426_v53 = vsub.f32 1.5, %v425_v35 }
  0x68   :  { %v434_v55 = vmul.f32 %v636_v39, %v433_v50  ;;  %v443_v22 = vmul.f32 %v638_v51, %v1253_v33  ;;  %v516_v60 = vmul.f32 %v768_v45, %v411_v16  ;;  %v421_v57 = vsel %vm1322_vm12, %v1255_v11, %v417_v54 }
  0x69   :  { %547 = vst [vmem:[#allocation7 + $0xb0] sm:$0xff] %v515_v56  ;;  %vm439_vm15 = vweird.f32 %v636_v39  ;;  %v517_v3 = vmul.f32 %v768_v45, %v421_v57  ;;  %v427_v4 = vmul.f32 %v1269_v25, %v426_v53  ;;  %vm448_vm0 = vweird.f32 %v1253_v33 }
  0x6a   :  { %v435_v6 = vmul.f32 0.5, %v434_v55  ;;  %v444_v0 = vmul.f32 %v638_v51, %v443_v22  ;;  %548 = vst [vmem:[#allocation7 + $0xb8] sm:$0xff] %v516_v60  ;;  %v169_v27 = vadd.f32 1.0, %v137_v52  ;;  %v105_v46 = vmul.f32 %v73_v58, %v73_v58  ;;  %vm440_vm1 = vmor %vm438_vm14, %vm439_vm15 }
  0x6b   :  { %v106_v7 = vmul.f32 %v74_v1, %v74_v1  ;;  %549 = vst [vmem:[#allocation7 + $0xc0] sm:$0xff] %v517_v3  ;;  %v431_v61 = vsel %vm1343_vm13, %v1269_v25, %v427_v4  ;;  %vm449_vm5 = vweird.f32 %v638_v51  ;;  %vm458_vm3 = vweird.f32 %v1312_v41 }
  0x6c   :  { %v436_v9 = vsub.f32 1.5, %v435_v6  ;;  %v445_v10 = vmul.f32 0.5, %v444_v0  ;;  %v518_v11 = vmul.f32 %v768_v45, %v431_v61  ;;  %641 = vrsqrt.f32 %v169_v27  ;;  %vm450_vm2 = vmor %vm448_vm0, %vm449_vm5 }
  0x6d   :  { %v640_v38 = vpop.eup %639  ;;  %v138_v13 = vmul.f32 %v744_v18, %v105_v46  ;;  %v139_v17 = vmul.f32 %v744_v18, %v106_v7  ;;  %vm468_vm7 = vweird.f32 %v169_v27 }
  0x6e   :  { %v437_v14 = vmul.f32 %v636_v39, %v436_v9  ;;  %v446_v15 = vsub.f32 1.5, %v445_v10  ;;  %v453_v2 = vmul.f32 %v640_v38, %v1312_v41  ;;  %550 = vst [vmem:[#allocation7 + $0xc8] sm:$0xff] %v518_v11  ;;  %vm459_vm6 = vweird.f32 %v640_v38 }
  0x6f   :  { %v170_v5 = vadd.f32 1.0, %v138_v13  ;;  %v171_v24 = vadd.f32 1.0, %v139_v17  ;;  %vm460_vm4 = vmor %vm458_vm3, %vm459_vm6 }
  0x70   :  { %v441_v20 = vsel %vm440_vm1, %v636_v39, %v437_v14  ;;  %v447_v21 = vmul.f32 %v638_v51, %v446_v15  ;;  %v454_v23 = vmul.f32 %v640_v38, %v453_v2 }
  0x71   :  { %v519_v48 = vmul.f32 %v768_v45, %v441_v20  ;;  %643 = vrsqrt.f32 %v170_v5  ;;  %vm478_vm10 = vweird.f32 %v170_v5  ;;  %vm488_vm12 = vweird.f32 %v171_v24 }
  0x72   :  { %v451_v25 = vsel %vm450_vm2, %v638_v51, %v447_v21  ;;  %v455_v63 = vmul.f32 0.5, %v454_v23  ;;  %v642_v49 = vpop.eup %641  ;;  %645 = vrsqrt.f32 %v171_v24 }
  0x73   :  { %551 = vst [vmem:[#allocation7 + $0xd0] sm:$0xff] %v519_v48  ;;  %v520_v33 = vmul.f32 %v768_v45, %v451_v25  ;;  %v463_v28 = vmul.f32 %v642_v49, %v169_v27  ;;  %vm469_vm8 = vweird.f32 %v642_v49 }
  0x74   :  { %v456_v26 = vsub.f32 1.5, %v455_v63  ;;  %vm470_vm9 = vmor %vm468_vm7, %vm469_vm8 }
  0x75   :  { %552 = vst [vmem:[#allocation7 + $0xd8] sm:$0xff] %v520_v33  ;;  %v464_v19 = vmul.f32 %v642_v49, %v463_v28 }
  0x76   :  { %v457_v18 = vmul.f32 %v640_v38, %v456_v26 }
  0x77   :  { %v644_v29 = vpop.eup %643  ;;  %v465_v62 = vmul.f32 0.5, %v464_v19 }
  0x78   :  { %v461_v12 = vsel %vm460_vm4, %v640_v38, %v457_v18  ;;  %v473_v31 = vmul.f32 %v644_v29, %v170_v5  ;;  %v646_v32 = vpop.eup %645  ;;  %vm479_vm11 = vweird.f32 %v644_v29 }
  0x79   :  { %v521_v36 = vmul.f32 %v768_v45, %v461_v12  ;;  %v466_v37 = vsub.f32 1.5, %v465_v62  ;;  %v483_v8 = vmul.f32 %v646_v32, %v171_v24  ;;  %vm489_vm13 = vweird.f32 %v646_v32  ;;  %vm480_vm14 = vmor %vm478_vm10, %vm479_vm11 }
  0x7a   :  { %v474_v34 = vmul.f32 %v644_v29, %v473_v31  ;;  %vm490_vm15 = vmor %vm488_vm12, %vm489_vm13 }
  0x7b   :  { %553 = vst [vmem:[#allocation7 + $0xe0] sm:$0xff] %v521_v36  ;;  %v467_v39 = vmul.f32 %v642_v49, %v466_v37  ;;  %v484_v40 = vmul.f32 %v646_v32, %v483_v8 }
  0x7c   :  { %v475_v59 = vmul.f32 0.5, %v474_v34 }
  0x7d   :  { %v471_v44 = vsel %vm470_vm9, %v642_v49, %v467_v39  ;;  %v485_v47 = vmul.f32 0.5, %v484_v40 }
  0x7e   :  { %v476_v41 = vsub.f32 1.5, %v475_v59  ;;  %v522_v43 = vmul.f32 %v768_v45, %v471_v44 }
  0x7f   :  { %v486_v35 = vsub.f32 1.5, %v485_v47 }
  0x80   :  { %v477_v30 = vmul.f32 %v644_v29, %v476_v41  ;;  %554 = vst [vmem:[#allocation7 + $0xe8] sm:$0xff] %v522_v43 }
  0x81   :  { %v487_v51 = vmul.f32 %v646_v32, %v486_v35 }
  0x82   :  { %v481_v50 = vsel %vm480_vm14, %v644_v29, %v477_v30 }
  0x83   :  { %v523_v56 = vmul.f32 %v768_v45, %v481_v50  ;;  %v491_v54 = vsel %vm490_vm15, %v646_v32, %v487_v51 }
  0x84   :  { %v524_v52 = vmul.f32 %v768_v45, %v491_v54 }
  0x85   :  { %555 = vst [vmem:[#allocation7 + $0xf0] sm:$0xff] %v523_v56 }
  0x86   :  { %556 = vst [vmem:[#allocation7 + $0xf8] sm:$0xff] %v524_v52 }
  0x87   :  { %569 = dma.vmem_to_hbm [thread:$0]  %s562_s21, 4096, %s564_s24, [#allocation4], %s715_s18, %s715_s18, %s716_s19  }
  0x88   :  { %711 = dma.done.wait [#allocation4], 4096  }
  0x89   :  { %712 = vsyncadd [#allocation4], 4294963200 }
  0x8a   :  { %574 = vsyncpa [#allocation3], 1 }
  0x8b   :  { %575 = vsyncpa [#allocation4], 1 }
  0x8c   :  { %576 = vsyncpa [#allocation5], 1 }

</bundles_post_ra>
